<compile_context>
chip_gen: v7x
topology: tpu7x:2x2x1
jax: 0.10.0
libtpu: 0.0.40
codegen_flags: <defaults>
</compile_context>

<pallas_src>
import jax
import jax.numpy as jnp
from jax import lax
from jax.experimental import pallas as pl
from jax.experimental.pallas import tpu as pltpu
import numpy as np


def rnn_kernel(tokens_ref, emb_ref, wih_ref, whh_ref, b_ref, wfc_ref, bfc_ref,
               out_ref, xbuf_ref, xp_ref):
    """tokens: (B, T) int32 in SMEM; emb: (V, E); wih: (E, H); whh: (H, H);
    b: (1, H); wfc: (H, O); bfc: (1, O); out: (B, O);
    xbuf scratch: (T*B, E); xp scratch: (T*B, H). Time-major row order r = t*B + b."""
    B, T = tokens_ref.shape
    H = whh_ref.shape[0]

    # 1) Fused embedding gather: dynamic row reads of the VMEM table driven by
    #    SMEM token scalars, written time-major into xbuf.
    for t in range(T):
        for b in range(B):
            tok = tokens_ref[b, t]
            xbuf_ref[pl.ds(t * B + b, 1), :] = emb_ref[pl.ds(tok, 1), :]

    # 2) Hoisted input projection: one matmul for all T*B rows, bias folded in.
    xp_ref[...] = (
        jnp.dot(xbuf_ref[...], wih_ref[...], preferred_element_type=jnp.float32)
        + b_ref[...]
    )

    # 3) Recurrence: only h @ W_hh is serial; h stays in registers (loop carry).
    whh = whh_ref[...]

    def step(t, h):
        x_t = xp_ref[pl.ds(t * B, B), :]                       # (B, H)
        return jnp.tanh(
            x_t + jnp.dot(h, whh, preferred_element_type=jnp.float32))

    h_last = lax.fori_loop(0, T, step, jnp.zeros((B, H), jnp.float32),
                           unroll=True)

    # 4) Head: out = relu(h_T @ W_fc + b_fc)
    logits = (jnp.dot(h_last, wfc_ref[...], preferred_element_type=jnp.float32)
              + bfc_ref[...])
    out_ref[...] = jnp.maximum(logits, 0.0)


def rnn_forward(tokens, emb_table, w_ih, w_hh, b, w_fc, b_fc):
    B, T = tokens.shape
    E = emb_table.shape[1]
    H = w_hh.shape[0]
    O = w_fc.shape[1]

    return pl.pallas_call(
        rnn_kernel,
        out_shape=jax.ShapeDtypeStruct((B, O), jnp.float32),
        in_specs=[
            pl.BlockSpec(memory_space=pltpu.MemorySpace.SMEM),   # tokens (scalars)
            pl.BlockSpec(memory_space=pltpu.MemorySpace.VMEM),   # emb_table
            pl.BlockSpec(memory_space=pltpu.MemorySpace.VMEM),   # w_ih
            pl.BlockSpec(memory_space=pltpu.MemorySpace.VMEM),   # w_hh
            pl.BlockSpec(memory_space=pltpu.MemorySpace.VMEM),   # b (fused rnn bias)
            pl.BlockSpec(memory_space=pltpu.MemorySpace.VMEM),   # w_fc
            pl.BlockSpec(memory_space=pltpu.MemorySpace.VMEM),   # b_fc
        ],
        out_specs=pl.BlockSpec(memory_space=pltpu.MemorySpace.VMEM),
        scratch_shapes=[
            pltpu.VMEM((T * B, E), jnp.float32),   # gathered embeddings (time-major)
            pltpu.VMEM((T * B, H), jnp.float32),   # hoisted input projection
        ],
    )(tokens, emb_table, w_ih, w_hh, b, w_fc, b_fc)


def reference_forward(tokens, emb_table, w_ih, w_hh, b, w_fc, b_fc):
    embed = jnp.take(emb_table, tokens, axis=0)           # (B, T, E)
    B, T, E = embed.shape
    H = w_hh.shape[0]
    h = jnp.zeros((B, H), jnp.float32)
    for t in range(T):
        h = jnp.tanh(embed[:, t, :] @ w_ih + h @ w_hh + b)
    return jnp.maximum(h @ w_fc + b_fc, 0.0)


if __name__ == "__main__":
    # Small shapes consistent with the module's forward.
    vocab_size = 50
    embedding_size = 16
    hidden_size = 32
    output_size = 4
    padding_idx = 0
    B, T = 2, 8

    key = jax.random.PRNGKey(0)
    k_emb, k_ih, k_hh, k_bih, k_bhh, k_fc, k_bfc, k_tok = jax.random.split(key, 8)

    # Deterministic synthetic parameters (shapes match the PyTorch module).
    emb_table = jax.random.normal(k_emb, (vocab_size, embedding_size), jnp.float32)
    emb_table = emb_table.at[padding_idx].set(0.0)        # padding_idx row zeroed

    s = 1.0 / np.sqrt(hidden_size)
    w_ih = jax.random.uniform(k_ih, (embedding_size, hidden_size), jnp.float32, -s, s)
    w_hh = jax.random.uniform(k_hh, (hidden_size, hidden_size), jnp.float32, -s, s)
    b_ih = jax.random.uniform(k_bih, (1, hidden_size), jnp.float32, -s, s)
    b_hh = jax.random.uniform(k_bhh, (1, hidden_size), jnp.float32, -s, s)
    b = b_ih + b_hh                                        # fused RNN biases

    sf = 1.0 / np.sqrt(hidden_size)
    w_fc = jax.random.uniform(k_fc, (hidden_size, output_size), jnp.float32, -sf, sf)
    b_fc = jax.random.uniform(k_bfc, (1, output_size), jnp.float32, -sf, sf)

    tokens = jax.random.randint(k_tok, (B, T), 0, vocab_size, jnp.int32)

    out = rnn_forward(tokens, emb_table, w_ih, w_hh, b, w_fc, b_fc)
    out = jax.block_until_ready(out)

    ref = reference_forward(tokens, emb_table, w_ih, w_hh, b, w_fc, b_fc)
    np.testing.assert_allclose(np.asarray(out), np.asarray(ref), rtol=1e-5, atol=1e-5)

    print("KERNEL_OK")
</pallas_src>

<mosaic_0001>
module attributes {stable_mosaic.version = 11 : i64} {
  func.func @rnn_kernel(%arg0: memref<2x8xi32, #tpu.memory_space<smem>>, %arg1: memref<50x16xf32, #tpu.memory_space<vmem>>, %arg2: memref<16x32xf32, #tpu.memory_space<vmem>>, %arg3: memref<32x32xf32, #tpu.memory_space<vmem>>, %arg4: memref<1x32xf32, #tpu.memory_space<vmem>>, %arg5: memref<32x4xf32, #tpu.memory_space<vmem>>, %arg6: memref<1x4xf32, #tpu.memory_space<vmem>>, %arg7: memref<2x4xf32, #tpu.memory_space<vmem>>, %arg8: memref<16x16xf32, #tpu.memory_space<vmem>>, %arg9: memref<16x32xf32, #tpu.memory_space<vmem>>) attributes {dimension_semantics = [], scalar_prefetch = 0 : i64, scratch_operands = 2 : i64, tpu.core_type = #tpu.core_type<tc>} {
    %c0 = arith.constant 0 : index
    %c0_0 = arith.constant 0 : index
    %0 = memref.load %arg0[%c0, %c0_0] : memref<2x8xi32, #tpu.memory_space<smem>>
    %1 = arith.index_cast %0 : i32 to index
    %c0_1 = arith.constant 0 : index
    %2 = vector.load %arg1[%1, %c0_1] : memref<50x16xf32, #tpu.memory_space<vmem>>, vector<1x16xf32>
    %c0_2 = arith.constant 0 : index
    %c0_3 = arith.constant 0 : index
    %3 = vector.load %arg8[%c0_2, %c0_3] : memref<16x16xf32, #tpu.memory_space<vmem>>, vector<1x16xf32>
    tpu.vector_store %arg8[%c0_2, %c0_3], %2 {strides = array<i32>} : memref<16x16xf32, #tpu.memory_space<vmem>>, vector<1x16xf32>,
    %c1 = arith.constant 1 : index
    %c0_4 = arith.constant 0 : index
    %4 = memref.load %arg0[%c1, %c0_4] : memref<2x8xi32, #tpu.memory_space<smem>>
    %5 = arith.index_cast %4 : i32 to index
    %c0_5 = arith.constant 0 : index
    %6 = vector.load %arg1[%5, %c0_5] : memref<50x16xf32, #tpu.memory_space<vmem>>, vector<1x16xf32>
    %c1_6 = arith.constant 1 : index
    %c0_7 = arith.constant 0 : index
    %7 = vector.load %arg8[%c1_6, %c0_7] : memref<16x16xf32, #tpu.memory_space<vmem>>, vector<1x16xf32>
    tpu.vector_store %arg8[%c1_6, %c0_7], %6 {strides = array<i32>} : memref<16x16xf32, #tpu.memory_space<vmem>>, vector<1x16xf32>,
    %c0_8 = arith.constant 0 : index
    %c1_9 = arith.constant 1 : index
    %8 = memref.load %arg0[%c0_8, %c1_9] : memref<2x8xi32, #tpu.memory_space<smem>>
    %9 = arith.index_cast %8 : i32 to index
    %c0_10 = arith.constant 0 : index
    %10 = vector.load %arg1[%9, %c0_10] : memref<50x16xf32, #tpu.memory_space<vmem>>, vector<1x16xf32>
    %c2 = arith.constant 2 : index
    %c0_11 = arith.constant 0 : index
    %11 = vector.load %arg8[%c2, %c0_11] : memref<16x16xf32, #tpu.memory_space<vmem>>, vector<1x16xf32>
    tpu.vector_store %arg8[%c2, %c0_11], %10 {strides = array<i32>} : memref<16x16xf32, #tpu.memory_space<vmem>>, vector<1x16xf32>,
    %c1_12 = arith.constant 1 : index
    %c1_13 = arith.constant 1 : index
    %12 = memref.load %arg0[%c1_12, %c1_13] : memref<2x8xi32, #tpu.memory_space<smem>>
    %13 = arith.index_cast %12 : i32 to index
    %c0_14 = arith.constant 0 : index
    %14 = vector.load %arg1[%13, %c0_14] : memref<50x16xf32, #tpu.memory_space<vmem>>, vector<1x16xf32>
    %c3 = arith.constant 3 : index
    %c0_15 = arith.constant 0 : index
    %15 = vector.load %arg8[%c3, %c0_15] : memref<16x16xf32, #tpu.memory_space<vmem>>, vector<1x16xf32>
    tpu.vector_store %arg8[%c3, %c0_15], %14 {strides = array<i32>} : memref<16x16xf32, #tpu.memory_space<vmem>>, vector<1x16xf32>,
    %c0_16 = arith.constant 0 : index
    %c2_17 = arith.constant 2 : index
    %16 = memref.load %arg0[%c0_16, %c2_17] : memref<2x8xi32, #tpu.memory_space<smem>>
    %17 = arith.index_cast %16 : i32 to index
    %c0_18 = arith.constant 0 : index
    %18 = vector.load %arg1[%17, %c0_18] : memref<50x16xf32, #tpu.memory_space<vmem>>, vector<1x16xf32>
    %c4 = arith.constant 4 : index
    %c0_19 = arith.constant 0 : index
    %19 = vector.load %arg8[%c4, %c0_19] : memref<16x16xf32, #tpu.memory_space<vmem>>, vector<1x16xf32>
    tpu.vector_store %arg8[%c4, %c0_19], %18 {strides = array<i32>} : memref<16x16xf32, #tpu.memory_space<vmem>>, vector<1x16xf32>,
    %c1_20 = arith.constant 1 : index
    %c2_21 = arith.constant 2 : index
    %20 = memref.load %arg0[%c1_20, %c2_21] : memref<2x8xi32, #tpu.memory_space<smem>>
    %21 = arith.index_cast %20 : i32 to index
    %c0_22 = arith.constant 0 : index
    %22 = vector.load %arg1[%21, %c0_22] : memref<50x16xf32, #tpu.memory_space<vmem>>, vector<1x16xf32>
    %c5 = arith.constant 5 : index
    %c0_23 = arith.constant 0 : index
    %23 = vector.load %arg8[%c5, %c0_23] : memref<16x16xf32, #tpu.memory_space<vmem>>, vector<1x16xf32>
    tpu.vector_store %arg8[%c5, %c0_23], %22 {strides = array<i32>} : memref<16x16xf32, #tpu.memory_space<vmem>>, vector<1x16xf32>,
    %c0_24 = arith.constant 0 : index
    %c3_25 = arith.constant 3 : index
    %24 = memref.load %arg0[%c0_24, %c3_25] : memref<2x8xi32, #tpu.memory_space<smem>>
    %25 = arith.index_cast %24 : i32 to index
    %c0_26 = arith.constant 0 : index
    %26 = vector.load %arg1[%25, %c0_26] : memref<50x16xf32, #tpu.memory_space<vmem>>, vector<1x16xf32>
    %c6 = arith.constant 6 : index
    %c0_27 = arith.constant 0 : index
    %27 = vector.load %arg8[%c6, %c0_27] : memref<16x16xf32, #tpu.memory_space<vmem>>, vector<1x16xf32>
    tpu.vector_store %arg8[%c6, %c0_27], %26 {strides = array<i32>} : memref<16x16xf32, #tpu.memory_space<vmem>>, vector<1x16xf32>,
    %c1_28 = arith.constant 1 : index
    %c3_29 = arith.constant 3 : index
    %28 = memref.load %arg0[%c1_28, %c3_29] : memref<2x8xi32, #tpu.memory_space<smem>>
    %29 = arith.index_cast %28 : i32 to index
    %c0_30 = arith.constant 0 : index
    %30 = vector.load %arg1[%29, %c0_30] : memref<50x16xf32, #tpu.memory_space<vmem>>, vector<1x16xf32>
    %c7 = arith.constant 7 : index
    %c0_31 = arith.constant 0 : index
    %31 = vector.load %arg8[%c7, %c0_31] : memref<16x16xf32, #tpu.memory_space<vmem>>, vector<1x16xf32>
    tpu.vector_store %arg8[%c7, %c0_31], %30 {strides = array<i32>} : memref<16x16xf32, #tpu.memory_space<vmem>>, vector<1x16xf32>,
    %c0_32 = arith.constant 0 : index
    %c4_33 = arith.constant 4 : index
    %32 = memref.load %arg0[%c0_32, %c4_33] : memref<2x8xi32, #tpu.memory_space<smem>>
    %33 = arith.index_cast %32 : i32 to index
    %c0_34 = arith.constant 0 : index
    %34 = vector.load %arg1[%33, %c0_34] : memref<50x16xf32, #tpu.memory_space<vmem>>, vector<1x16xf32>
    %c8 = arith.constant 8 : index
    %c0_35 = arith.constant 0 : index
    %35 = vector.load %arg8[%c8, %c0_35] : memref<16x16xf32, #tpu.memory_space<vmem>>, vector<1x16xf32>
    tpu.vector_store %arg8[%c8, %c0_35], %34 {strides = array<i32>} : memref<16x16xf32, #tpu.memory_space<vmem>>, vector<1x16xf32>,
    %c1_36 = arith.constant 1 : index
    %c4_37 = arith.constant 4 : index
    %36 = memref.load %arg0[%c1_36, %c4_37] : memref<2x8xi32, #tpu.memory_space<smem>>
    %37 = arith.index_cast %36 : i32 to index
    %c0_38 = arith.constant 0 : index
    %38 = vector.load %arg1[%37, %c0_38] : memref<50x16xf32, #tpu.memory_space<vmem>>, vector<1x16xf32>
    %c9 = arith.constant 9 : index
    %c0_39 = arith.constant 0 : index
    %39 = vector.load %arg8[%c9, %c0_39] : memref<16x16xf32, #tpu.memory_space<vmem>>, vector<1x16xf32>
    tpu.vector_store %arg8[%c9, %c0_39], %38 {strides = array<i32>} : memref<16x16xf32, #tpu.memory_space<vmem>>, vector<1x16xf32>,
    %c0_40 = arith.constant 0 : index
    %c5_41 = arith.constant 5 : index
    %40 = memref.load %arg0[%c0_40, %c5_41] : memref<2x8xi32, #tpu.memory_space<smem>>
    %41 = arith.index_cast %40 : i32 to index
    %c0_42 = arith.constant 0 : index
    %42 = vector.load %arg1[%41, %c0_42] : memref<50x16xf32, #tpu.memory_space<vmem>>, vector<1x16xf32>
    %c10 = arith.constant 10 : index
    %c0_43 = arith.constant 0 : index
    %43 = vector.load %arg8[%c10, %c0_43] : memref<16x16xf32, #tpu.memory_space<vmem>>, vector<1x16xf32>
    tpu.vector_store %arg8[%c10, %c0_43], %42 {strides = array<i32>} : memref<16x16xf32, #tpu.memory_space<vmem>>, vector<1x16xf32>,
    %c1_44 = arith.constant 1 : index
    %c5_45 = arith.constant 5 : index
    %44 = memref.load %arg0[%c1_44, %c5_45] : memref<2x8xi32, #tpu.memory_space<smem>>
    %45 = arith.index_cast %44 : i32 to index
    %c0_46 = arith.constant 0 : index
    %46 = vector.load %arg1[%45, %c0_46] : memref<50x16xf32, #tpu.memory_space<vmem>>, vector<1x16xf32>
    %c11 = arith.constant 11 : index
    %c0_47 = arith.constant 0 : index
    %47 = vector.load %arg8[%c11, %c0_47] : memref<16x16xf32, #tpu.memory_space<vmem>>, vector<1x16xf32>
    tpu.vector_store %arg8[%c11, %c0_47], %46 {strides = array<i32>} : memref<16x16xf32, #tpu.memory_space<vmem>>, vector<1x16xf32>,
    %c0_48 = arith.constant 0 : index
    %c6_49 = arith.constant 6 : index
    %48 = memref.load %arg0[%c0_48, %c6_49] : memref<2x8xi32, #tpu.memory_space<smem>>
    %49 = arith.index_cast %48 : i32 to index
    %c0_50 = arith.constant 0 : index
    %50 = vector.load %arg1[%49, %c0_50] : memref<50x16xf32, #tpu.memory_space<vmem>>, vector<1x16xf32>
    %c12 = arith.constant 12 : index
    %c0_51 = arith.constant 0 : index
    %51 = vector.load %arg8[%c12, %c0_51] : memref<16x16xf32, #tpu.memory_space<vmem>>, vector<1x16xf32>
    tpu.vector_store %arg8[%c12, %c0_51], %50 {strides = array<i32>} : memref<16x16xf32, #tpu.memory_space<vmem>>, vector<1x16xf32>,
    %c1_52 = arith.constant 1 : index
    %c6_53 = arith.constant 6 : index
    %52 = memref.load %arg0[%c1_52, %c6_53] : memref<2x8xi32, #tpu.memory_space<smem>>
    %53 = arith.index_cast %52 : i32 to index
    %c0_54 = arith.constant 0 : index
    %54 = vector.load %arg1[%53, %c0_54] : memref<50x16xf32, #tpu.memory_space<vmem>>, vector<1x16xf32>
    %c13 = arith.constant 13 : index
    %c0_55 = arith.constant 0 : index
    %55 = vector.load %arg8[%c13, %c0_55] : memref<16x16xf32, #tpu.memory_space<vmem>>, vector<1x16xf32>
    tpu.vector_store %arg8[%c13, %c0_55], %54 {strides = array<i32>} : memref<16x16xf32, #tpu.memory_space<vmem>>, vector<1x16xf32>,
    %c0_56 = arith.constant 0 : index
    %c7_57 = arith.constant 7 : index
    %56 = memref.load %arg0[%c0_56, %c7_57] : memref<2x8xi32, #tpu.memory_space<smem>>
    %57 = arith.index_cast %56 : i32 to index
    %c0_58 = arith.constant 0 : index
    %58 = vector.load %arg1[%57, %c0_58] : memref<50x16xf32, #tpu.memory_space<vmem>>, vector<1x16xf32>
    %c14 = arith.constant 14 : index
    %c0_59 = arith.constant 0 : index
    %59 = vector.load %arg8[%c14, %c0_59] : memref<16x16xf32, #tpu.memory_space<vmem>>, vector<1x16xf32>
    tpu.vector_store %arg8[%c14, %c0_59], %58 {strides = array<i32>} : memref<16x16xf32, #tpu.memory_space<vmem>>, vector<1x16xf32>,
    %c1_60 = arith.constant 1 : index
    %c7_61 = arith.constant 7 : index
    %60 = memref.load %arg0[%c1_60, %c7_61] : memref<2x8xi32, #tpu.memory_space<smem>>
    %61 = arith.index_cast %60 : i32 to index
    %c0_62 = arith.constant 0 : index
    %62 = vector.load %arg1[%61, %c0_62] : memref<50x16xf32, #tpu.memory_space<vmem>>, vector<1x16xf32>
    %c15 = arith.constant 15 : index
    %c0_63 = arith.constant 0 : index
    %63 = vector.load %arg8[%c15, %c0_63] : memref<16x16xf32, #tpu.memory_space<vmem>>, vector<1x16xf32>
    tpu.vector_store %arg8[%c15, %c0_63], %62 {strides = array<i32>} : memref<16x16xf32, #tpu.memory_space<vmem>>, vector<1x16xf32>,
    %c0_64 = arith.constant 0 : index
    %c0_65 = arith.constant 0 : index
    %64 = vector.load %arg8[%c0_64, %c0_65] : memref<16x16xf32, #tpu.memory_space<vmem>>, vector<16x16xf32>
    %c0_66 = arith.constant 0 : index
    %c0_67 = arith.constant 0 : index
    %65 = vector.load %arg2[%c0_66, %c0_67] : memref<16x32xf32, #tpu.memory_space<vmem>>, vector<16x32xf32>
    %cst = arith.constant dense<0.000000e+00> : vector<16x32xf32>
    %66 = tpu.matmul %64, %65, %cst {dimension_numbers = #tpu.dot_dimension_numbers<[1], [0], [0], [1], [0, 0, 1, 1], [], []>} : vector<16x16xf32>, vector<16x32xf32>, vector<16x32xf32> -> vector<16x32xf32>
    %c0_68 = arith.constant 0 : index
    %c0_69 = arith.constant 0 : index
    %67 = vector.load %arg4[%c0_68, %c0_69] : memref<1x32xf32, #tpu.memory_space<vmem>>, vector<1x32xf32>
    %68 = vector.broadcast %67 : vector<1x32xf32> to vector<16x32xf32>
    %69 = arith.addf %66, %68 : vector<16x32xf32>
    %c0_70 = arith.constant 0 : index
    %c0_71 = arith.constant 0 : index
    %70 = vector.load %arg9[%c0_70, %c0_71] : memref<16x32xf32, #tpu.memory_space<vmem>>, vector<16x32xf32>
    tpu.vector_store %arg9[%c0_70, %c0_71], %69 {strides = array<i32>} : memref<16x32xf32, #tpu.memory_space<vmem>>, vector<16x32xf32>,
    %c0_72 = arith.constant 0 : index
    %c0_73 = arith.constant 0 : index
    %71 = vector.load %arg3[%c0_72, %c0_73] : memref<32x32xf32, #tpu.memory_space<vmem>>, vector<32x32xf32>
    %cst_74 = arith.constant 0.000000e+00 : f32
    %72 = vector.broadcast %cst_74 : f32 to vector<2x32xf32>
    %c0_i32 = arith.constant 0 : i32
    %c2_i32 = arith.constant 2 : i32
    %73 = arith.muli %c0_i32, %c2_i32 : i32
    %74 = arith.index_cast %73 : i32 to index
    %c0_75 = arith.constant 0 : index
    %75 = vector.load %arg9[%74, %c0_75] : memref<16x32xf32, #tpu.memory_space<vmem>>, vector<2x32xf32>
    %cst_76 = arith.constant dense<0.000000e+00> : vector<2x32xf32>
    %76 = tpu.matmul %72, %71, %cst_76 {dimension_numbers = #tpu.dot_dimension_numbers<[1], [0], [0], [1], [0, 0, 1, 1], [], []>} : vector<2x32xf32>, vector<32x32xf32>, vector<2x32xf32> -> vector<2x32xf32>
    %77 = arith.addf %75, %76 : vector<2x32xf32>
    %78 = math.tanh %77 : vector<2x32xf32>
    %c1_i32 = arith.constant 1 : i32
    %c2_i32_77 = arith.constant 2 : i32
    %79 = arith.muli %c1_i32, %c2_i32_77 : i32
    %80 = arith.index_cast %79 : i32 to index
    %c0_78 = arith.constant 0 : index
    %81 = vector.load %arg9[%80, %c0_78] : memref<16x32xf32, #tpu.memory_space<vmem>>, vector<2x32xf32>
    %cst_79 = arith.constant dense<0.000000e+00> : vector<2x32xf32>
    %82 = tpu.matmul %78, %71, %cst_79 {dimension_numbers = #tpu.dot_dimension_numbers<[1], [0], [0], [1], [0, 0, 1, 1], [], []>} : vector<2x32xf32>, vector<32x32xf32>, vector<2x32xf32> -> vector<2x32xf32>
    %83 = arith.addf %81, %82 : vector<2x32xf32>
    %84 = math.tanh %83 : vector<2x32xf32>
    %c2_i32_80 = arith.constant 2 : i32
    %c2_i32_81 = arith.constant 2 : i32
    %85 = arith.muli %c2_i32_80, %c2_i32_81 : i32
    %86 = arith.index_cast %85 : i32 to index
    %c0_82 = arith.constant 0 : index
    %87 = vector.load %arg9[%86, %c0_82] : memref<16x32xf32, #tpu.memory_space<vmem>>, vector<2x32xf32>
    %cst_83 = arith.constant dense<0.000000e+00> : vector<2x32xf32>
    %88 = tpu.matmul %84, %71, %cst_83 {dimension_numbers = #tpu.dot_dimension_numbers<[1], [0], [0], [1], [0, 0, 1, 1], [], []>} : vector<2x32xf32>, vector<32x32xf32>, vector<2x32xf32> -> vector<2x32xf32>
    %89 = arith.addf %87, %88 : vector<2x32xf32>
    %90 = math.tanh %89 : vector<2x32xf32>
    %c3_i32 = arith.constant 3 : i32
    %c2_i32_84 = arith.constant 2 : i32
    %91 = arith.muli %c3_i32, %c2_i32_84 : i32
    %92 = arith.index_cast %91 : i32 to index
    %c0_85 = arith.constant 0 : index
    %93 = vector.load %arg9[%92, %c0_85] : memref<16x32xf32, #tpu.memory_space<vmem>>, vector<2x32xf32>
    %cst_86 = arith.constant dense<0.000000e+00> : vector<2x32xf32>
    %94 = tpu.matmul %90, %71, %cst_86 {dimension_numbers = #tpu.dot_dimension_numbers<[1], [0], [0], [1], [0, 0, 1, 1], [], []>} : vector<2x32xf32>, vector<32x32xf32>, vector<2x32xf32> -> vector<2x32xf32>
    %95 = arith.addf %93, %94 : vector<2x32xf32>
    %96 = math.tanh %95 : vector<2x32xf32>
    %c4_i32 = arith.constant 4 : i32
    %c2_i32_87 = arith.constant 2 : i32
    %97 = arith.muli %c4_i32, %c2_i32_87 : i32
    %98 = arith.index_cast %97 : i32 to index
    %c0_88 = arith.constant 0 : index
    %99 = vector.load %arg9[%98, %c0_88] : memref<16x32xf32, #tpu.memory_space<vmem>>, vector<2x32xf32>
    %cst_89 = arith.constant dense<0.000000e+00> : vector<2x32xf32>
    %100 = tpu.matmul %96, %71, %cst_89 {dimension_numbers = #tpu.dot_dimension_numbers<[1], [0], [0], [1], [0, 0, 1, 1], [], []>} : vector<2x32xf32>, vector<32x32xf32>, vector<2x32xf32> -> vector<2x32xf32>
    %101 = arith.addf %99, %100 : vector<2x32xf32>
    %102 = math.tanh %101 : vector<2x32xf32>
    %c5_i32 = arith.constant 5 : i32
    %c2_i32_90 = arith.constant 2 : i32
    %103 = arith.muli %c5_i32, %c2_i32_90 : i32
    %104 = arith.index_cast %103 : i32 to index
    %c0_91 = arith.constant 0 : index
    %105 = vector.load %arg9[%104, %c0_91] : memref<16x32xf32, #tpu.memory_space<vmem>>, vector<2x32xf32>
    %cst_92 = arith.constant dense<0.000000e+00> : vector<2x32xf32>
    %106 = tpu.matmul %102, %71, %cst_92 {dimension_numbers = #tpu.dot_dimension_numbers<[1], [0], [0], [1], [0, 0, 1, 1], [], []>} : vector<2x32xf32>, vector<32x32xf32>, vector<2x32xf32> -> vector<2x32xf32>
    %107 = arith.addf %105, %106 : vector<2x32xf32>
    %108 = math.tanh %107 : vector<2x32xf32>
    %c6_i32 = arith.constant 6 : i32
    %c2_i32_93 = arith.constant 2 : i32
    %109 = arith.muli %c6_i32, %c2_i32_93 : i32
    %110 = arith.index_cast %109 : i32 to index
    %c0_94 = arith.constant 0 : index
    %111 = vector.load %arg9[%110, %c0_94] : memref<16x32xf32, #tpu.memory_space<vmem>>, vector<2x32xf32>
    %cst_95 = arith.constant dense<0.000000e+00> : vector<2x32xf32>
    %112 = tpu.matmul %108, %71, %cst_95 {dimension_numbers = #tpu.dot_dimension_numbers<[1], [0], [0], [1], [0, 0, 1, 1], [], []>} : vector<2x32xf32>, vector<32x32xf32>, vector<2x32xf32> -> vector<2x32xf32>
    %113 = arith.addf %111, %112 : vector<2x32xf32>
    %114 = math.tanh %113 : vector<2x32xf32>
    %c7_i32 = arith.constant 7 : i32
    %c2_i32_96 = arith.constant 2 : i32
    %115 = arith.muli %c7_i32, %c2_i32_96 : i32
    %116 = arith.index_cast %115 : i32 to index
    %c0_97 = arith.constant 0 : index
    %117 = vector.load %arg9[%116, %c0_97] : memref<16x32xf32, #tpu.memory_space<vmem>>, vector<2x32xf32>
    %cst_98 = arith.constant dense<0.000000e+00> : vector<2x32xf32>
    %118 = tpu.matmul %114, %71, %cst_98 {dimension_numbers = #tpu.dot_dimension_numbers<[1], [0], [0], [1], [0, 0, 1, 1], [], []>} : vector<2x32xf32>, vector<32x32xf32>, vector<2x32xf32> -> vector<2x32xf32>
    %119 = arith.addf %117, %118 : vector<2x32xf32>
    %120 = math.tanh %119 : vector<2x32xf32>
    %c8_i32 = arith.constant 8 : i32
    %c0_99 = arith.constant 0 : index
    %c0_100 = arith.constant 0 : index
    %121 = vector.load %arg5[%c0_99, %c0_100] : memref<32x4xf32, #tpu.memory_space<vmem>>, vector<32x4xf32>
    %cst_101 = arith.constant dense<0.000000e+00> : vector<2x4xf32>
    %122 = tpu.matmul %120, %121, %cst_101 {dimension_numbers = #tpu.dot_dimension_numbers<[1], [0], [0], [1], [0, 0, 1, 1], [], []>} : vector<2x32xf32>, vector<32x4xf32>, vector<2x4xf32> -> vector<2x4xf32>
    %c0_102 = arith.constant 0 : index
    %c0_103 = arith.constant 0 : index
    %123 = vector.load %arg6[%c0_102, %c0_103] : memref<1x4xf32, #tpu.memory_space<vmem>>, vector<1x4xf32>
    %124 = vector.broadcast %123 : vector<1x4xf32> to vector<2x4xf32>
    %125 = arith.addf %122, %124 : vector<2x4xf32>
    %cst_104 = arith.constant 0.000000e+00 : f32
    %126 = vector.broadcast %cst_104 : f32 to vector<2x4xf32>
    %127 = arith.maximumf %125, %126 : vector<2x4xf32>
    %c0_105 = arith.constant 0 : index
    %c0_106 = arith.constant 0 : index
    %128 = vector.load %arg7[%c0_105, %c0_106] : memref<2x4xf32, #tpu.memory_space<vmem>>, vector<2x4xf32>
    tpu.vector_store %arg7[%c0_105, %c0_106], %127 {strides = array<i32>} : memref<2x4xf32, #tpu.memory_space<vmem>>, vector<2x4xf32>,
    return
  }
}

</mosaic_0001>

<bundles_post_ra>
// kernel: tpu_custom_call.1
= control target key start
LH: loop header
LB: loop body
LE: loop exit
PB: predicated region body
PF: predicated region fallthrough
CT: control target
= control target key end

     0   :  { %12 = vsyncpa [#allocation6], 0  ;;  %s1495_s0 = inlined_call_operand.vmem [shape: s32[2,8], index: 0, kind: input, shape index: {}]   ;;  %s1496_s1 = inlined_call_operand.vmem [shape: f32[50,16], index: 1, kind: input, shape index: {}]   ;;  %s1497_s2 = inlined_call_operand.vmem [shape: f32[16,32], index: 2, kind: input, shape index: {}]   ;;  %s1498_s3 = inlined_call_operand.vmem [shape: f32[32,32], index: 3, kind: input, shape index: {}]   ;;  %s1499_s4 = inlined_call_operand.vmem [shape: f32[1,32], index: 4, kind: input, shape index: {}]   ;;  %s1500_s5 = inlined_call_operand.vmem [shape: f32[32,4], index: 5, kind: input, shape index: {}]   ;;  %s1501_s6 = inlined_call_operand.vmem [shape: f32[1,4], index: 6, kind: input, shape index: {}]   ;;  %s1502_s7 = inlined_call_operand.hbm [shape: f32[2,4], index: 7, kind: output, shape index: {}]  }
   0x1   :  { %13 = vsyncpa [#allocation5], 0  ;;  %s20_s26 = sshll.u32 %s1495_s0, 4  ;;  %s21_s26 = int_to_ptr.vmem [resolvable:$true] %s20_s26 }
   0x2   :  { %s1192_s27 = scalar_lea.vmem %s21_s26, 32  ;;  %p1197_p1 = scmp.lt.s32.totalorder %s21_s26, %s21_s26 }
   0x3   :  { %p1193_p0 = scmp.ne.s32.totalorder %s21_s26, %s1192_s27  ;;  %p1198_p2 = scmp.lt.s32.totalorder %s1192_s27, %s1192_s27 }
   0x5   :  { %p1199_p3 = por %p1198_p2, %p1197_p1 }
   0x7   :  { %p1200_p4 = pnand %p1199_p3, %p1193_p0 }
   0x9   :  { %1203 = shalt.err (!%p1200_p4)
}
   0xa   :  { %s1230_s28 = smov [#allocation4]  }
   0xb   :  { %23 = dma.vmem_to_smem %s21_s26, 32, %s1230_s28, [#allocation6]  }
   0xc   :  { %1226 = dma.done.wait [#allocation6], 32  }
   0xd   :  { %1227 = vsyncadd [#allocation6], 4294967264 }
   0xe   :  { %39 = sfence }
   0xf   :  { %v107_v0 = vld [vmem:[%s1497_s2] sm:$0xff]  ;;  %v108_v1 = vld [vmem:[%s1497_s2 + $0x8] sm:$0xff]  ;;  %s1284_s0 = sld [smem:[#allocation4]]  ;;  %s1288_s11 = sld [smem:[#allocation4 + $0x1]]  ;;  %v1231_v4 = vmov 0.0|0.0   ;;  %v203_v6 = vld [vmem:[%s1498_s3 + $0x10] sm:$0xff] }
  0x10   :  { %v1113_v2 = vpack.c.bf16 %v108_v1, %v107_v0  ;;  %s1286_s10 = sld [smem:[#allocation4 + $0x80]]  ;;  %v201_v3 = vld [vmem:[%s1498_s3] sm:$0xff]  ;;  %s1293_s14 = sld [smem:[#allocation4 + $0x81]]  ;;  %1117 = vmatprep.subr.bf16.mxu1 %v1231_v4  ;;  %v202_v5 = vld [vmem:[%s1498_s3 + $0x8] sm:$0xff]  ;;  %v204_v8 = vld [vmem:[%s1498_s3 + $0x18] sm:$0xff]  ;;  %vm43_vm0 = vcmask 122880  }
  0x11   :  { %s1295_s15 = sld [smem:[#allocation4 + $0x2]]  ;;  %s1306_s20 = sld [smem:[#allocation4 + $0x3]]  ;;  %v1308_v7 = vpack.c.bf16 %v202_v5, %v201_v3  ;;  %v1322_v9 = vpack.c.bf16 %v204_v8, %v203_v6  ;;  %vm1232_vm1 = vmmov 0   ;;  %v1233_v10 = vmov 0.0   ;;  %v946_v31 = vld [vmem:[%s1499_s4] ss:$0 sm:$0xff] }
  0x12   :  { %1114 = vmatprep.subr.bf16.mxu0 %v1113_v2  ;;  %s1304_s19 = sld [smem:[#allocation4 + $0x82]]  ;;  %s1313_s23 = sld [smem:[#allocation4 + $0x83]]  ;;  %1022 = vmatprep.mubr.msk.f32.mxu1 %vm1232_vm1, %v1233_v10  ;;  %vm116_vm2 = vcmask 130048   ;;  %vm198_vm3 = vcmask 261120   ;;  %v813_v6 = vld [vmem:[%s1500_s5] sm:$0xff]  ;;  %v815_v8 = vld [vmem:[%s1500_s5 + $0x10] sm:$0xff] }
  0x13   :  { %1116 = vmatpush3.bf16.msra.mxu0 %v1113_v2  ;;  %s1315_s24 = sld [smem:[#allocation4 + $0x4]]  ;;  %s1319_s26 = sld [smem:[#allocation4 + $0x5]]  ;;  %1119 = vmatpush3.bf16.msra.mxu1 %v1308_v7  ;;  %vm898_vm4 = vcmask 25600  }
  0x14   :  { %s1317_s25 = sld [smem:[#allocation4 + $0x84]]  ;;  %s1330_s29 = sld [smem:[#allocation4 + $0x85]]  ;;  %1120 = vmatprep.subr.bf16.mxu1 %v1231_v4  ;;  %1123 = vmatprep.subr.bf16.mxu0 %v1231_v4 }
  0x15   :  { %s41_s28 = scalar_lea.vmem %s1496_s1, %s1284_s0  ;;  %s50_s16 = scalar_lea.vmem %s1496_s1, %s1288_s11 }
  0x16   :  { %v42_v11 = vld [vmem:[%s41_s28] sm:$0x1]  ;;  %s46_s9 = scalar_lea.vmem %s1496_s1, %s1286_s10  ;;  %s54_s17 = scalar_lea.vmem %s1496_s1, %s1293_s14 }
  0x17   :  { %44 = vst.msk [vmem:[#allocation2] sm:$0x1] %vm43_vm0, %v42_v11  ;;  %v47_v12 = vld [vmem:[%s46_s9] sm:$0x1]  ;;  %s58_s22 = scalar_lea.vmem %s1496_s1, %s1295_s15  ;;  %s66_s14 = scalar_lea.vmem %s1496_s1, %s1306_s20  ;;  %1122 = vmatpush3.bf16.msra.mxu1 %v1322_v9 }
  0x18   :  { %v51_v13 = vld [vmem:[%s50_s16] sm:$0x1]  ;;  %48 = vst.msk [vmem:[#allocation2 + $0x1] sm:$0x1] %vm43_vm0, %v47_v12  ;;  %s62_s3 = scalar_lea.vmem %s1496_s1, %s1304_s19  ;;  %s70_s8 = scalar_lea.vmem %s1496_s1, %s1313_s23  ;;  %1129 = vmatprep.subr.bf16.mxu1 %v1231_v4 }
  0x19   :  { %52 = vst.msk [vmem:[#allocation2 + $0x2] sm:$0x1] %vm43_vm0, %v51_v13  ;;  %v55_v14 = vld [vmem:[%s54_s17] sm:$0x1]  ;;  %s74_s19 = scalar_lea.vmem %s1496_s1, %s1315_s24  ;;  %s82_s23 = scalar_lea.vmem %s1496_s1, %s1319_s26 }
  0x1a   :  { %v59_v15 = vld [vmem:[%s58_s22] sm:$0x1]  ;;  %56 = vst.msk [vmem:[#allocation2 + $0x3] sm:$0x1] %vm43_vm0, %v55_v14  ;;  %s78_s16 = scalar_lea.vmem %s1496_s1, %s1317_s25  ;;  %s86_s18 = scalar_lea.vmem %s1496_s1, %s1330_s29  ;;  %1023 = vmatmul.mubr.f32.vlgmr.msra.gmra.mrb[0].mxu1 %v1233_v10 }
  0x1b   :  { %60 = vst.msk [vmem:[#allocation2 + $0x4] sm:$0x1] %vm43_vm0, %v59_v15  ;;  %v63_v16 = vld [vmem:[%s62_s3] sm:$0x1]  ;;  %s942_s21 = sld [smem:[#allocation4 + $0x6]]  ;;  %s944_s26 = sld [smem:[#allocation4 + $0x7]]  ;;  %1131 = vmatpush3.bf16.msra.mxu1 %v1308_v7  ;;  %1044 = vmatprep.mubr.msk.f32.mxu1 %vm1232_vm1, %v1233_v10 }
  0x1c   :  { %v67_v17 = vld [vmem:[%s66_s14] sm:$0x1]  ;;  %64 = vst.msk [vmem:[#allocation2 + $0x5] sm:$0x1] %vm43_vm0, %v63_v16  ;;  %s943_s25 = sld [smem:[#allocation4 + $0x86]]  ;;  %s945_s22 = sld [smem:[#allocation4 + $0x87]]  ;;  %1132 = vmatprep.subr.bf16.mxu1 %v1231_v4 }
  0x1d   :  { %68 = vst.msk [vmem:[#allocation2 + $0x6] sm:$0x1] %vm43_vm0, %v67_v17  ;;  %v71_v18 = vld [vmem:[%s70_s8] sm:$0x1] }
  0x1e   :  { %v75_v19 = vld [vmem:[%s74_s19] sm:$0x1]  ;;  %72 = vst.msk [vmem:[#allocation2 + $0x7] sm:$0x1] %vm43_vm0, %v71_v18 }
  0x1f   :  { %76 = vst.msk [vmem:[#allocation2 + $0x8] sm:$0x1] %vm43_vm0, %v75_v19  ;;  %v79_v20 = vld [vmem:[%s78_s16] sm:$0x1]  ;;  %1134 = vmatpush3.bf16.msra.mxu1 %v1322_v9 }
  0x20   :  { %v83_v21 = vld [vmem:[%s82_s23] sm:$0x1]  ;;  %80 = vst.msk [vmem:[#allocation2 + $0x9] sm:$0x1] %vm43_vm0, %v79_v20  ;;  %1141 = vmatprep.subr.bf16.mxu1 %v1231_v4 }
  0x21   :  { %84 = vst.msk [vmem:[#allocation2 + $0xa] sm:$0x1] %vm43_vm0, %v83_v21  ;;  %v87_v22 = vld [vmem:[%s86_s18] sm:$0x1]  ;;  %s90_s11 = scalar_lea.vmem %s1496_s1, %s942_s21  ;;  %s98_s30 = scalar_lea.vmem %s1496_s1, %s944_s26 }
  0x22   :  { %88 = vst.msk [vmem:[#allocation2 + $0xb] sm:$0x1] %vm43_vm0, %v87_v22  ;;  %v91_v24 = vld [vmem:[%s90_s11] sm:$0x1]  ;;  %s94_s28 = scalar_lea.vmem %s1496_s1, %s943_s25  ;;  %s102_s12 = scalar_lea.vmem %s1496_s1, %s945_s22 }
  0x23   :  { %92 = vst.msk [vmem:[#allocation2 + $0xc] sm:$0x1] %vm43_vm0, %v91_v24  ;;  %v95_v25 = vld [vmem:[%s94_s28] sm:$0x1]  ;;  %s1234_s21 = smov [#allocation7]  }
  0x24   :  { %v99_v26 = vld [vmem:[%s98_s30] sm:$0x1]  ;;  %96 = vst.msk [vmem:[#allocation2 + $0xd] sm:$0x1] %vm43_vm0, %v95_v25 }
  0x25   :  { %v105_v23 = vld [vmem:[#allocation2] sm:$0xff]  ;;  %100 = vst.msk [vmem:[#allocation2 + $0xe] sm:$0x1] %vm43_vm0, %v99_v26 }
  0x26   :  { %1011 = vmatprep.mubr.msk.f32.mxu0 %vm116_vm2, %v105_v23  ;;  %v103_v27 = vld [vmem:[%s102_s12] sm:$0x1] }
  0x27   :  { %104 = vst.msk [vmem:[#allocation2 + $0xf] sm:$0x1] %vm43_vm0, %v103_v27  ;;  %v956_v17 = vld [vmem:[%s1501_s6] ss:$0 sm:$0xff] }
  0x2e   :  { %v106_v28 = vld [vmem:[#allocation2 + $0x8] sm:$0xff] }
  0x2f   :  { %1012 = vmatmul.mubr.msk.f32.vlgmr.msra.gmra.mrb[0].mxu0 %vm116_vm2, %v106_v28 }
  0x30   :  { %1125 = vmatpush3.bf16.msra.mxu0 %v1308_v7  ;;  %1033 = vmatprep.mubr.msk.f32.mxu0 %vm1232_vm1, %v1233_v10 }
  0x31   :  { %1126 = vmatprep.subr.bf16.mxu0 %v1231_v4 }
  0x34   :  { %1128 = vmatpush3.bf16.msra.mxu0 %v1322_v9 }
  0x35   :  { %1135 = vmatprep.subr.bf16.mxu0 %v1231_v4 }
  0xed   :  { %v275_v29 = vpop.f32.mrb[0].mxu1 }
  0xee   :  { %v1024_v30 = vpop.f32.mrb[1].mxu1 }
 0x102   :  { %v1013_v32 = vpop.f32.mrb[0].mxu0 }
 0x103   :  { %v195_v33 = vadd.f32 %v1013_v32, %v946_v31  ;;  %v189_v34 = vpop.f32.mrb[1].mxu0 }
 0x104   :  { %v190_v35 = vadd.f32 %v946_v31, %v189_v34 }
 0x105   :  { %200 = vst.msk [vmem:[#allocation3 + $0x8] sm:$0xff] %vm198_vm3, %v195_v33 }
 0x106   :  { %199 = vst.msk [vmem:[#allocation3] sm:$0xff] %vm198_vm3, %v190_v35 }
 0x10c   :  { %v509_v54 = vld [vmem:[#allocation3 + $0x8] sm:$0x3]  ;;  %v585_v59 = vld [vmem:[#allocation3 + $0xa] sm:$0x3]  ;;  %v661_v0 = vld [vmem:[#allocation3 + $0xc] sm:$0x3] }
 0x10d   :  { %v205_v36 = vld [vmem:[#allocation3] sm:$0x3]  ;;  %v281_v39 = vld [vmem:[#allocation3 + $0x2] sm:$0x3]  ;;  %v357_v44 = vld [vmem:[#allocation3 + $0x4] sm:$0x3] }
 0x10e   :  { %v279_v37 = vadd.f32 %v275_v29, %v205_v36  ;;  %v433_v49 = vld [vmem:[#allocation3 + $0x6] sm:$0x3]  ;;  %v737_v12 = vld [vmem:[#allocation3 + $0xe] sm:$0x3] }
 0x110   :  { %1176 = vtanh.f32 %v279_v37 }
 0x11a   :  { %v1177_v38 = vpop.eup %1176 }
 0x11b   :  { %1034 = vmatmul.mubr.msk.f32.vlgmr.msra.gmra.mrb[2].mxu0 %vm198_vm3, %v1177_v38 }
 0x11c   :  { %1137 = vmatpush3.bf16.msra.mxu0 %v1308_v7  ;;  %1055 = vmatprep.mubr.msk.f32.mxu0 %vm1232_vm1, %v1233_v10 }
 0x11d   :  { %1138 = vmatprep.subr.bf16.mxu0 %v1231_v4 }
 0x120   :  { %1140 = vmatpush3.bf16.msra.mxu0 %v1322_v9 }
 0x121   :  { %1147 = vmatprep.subr.bf16.mxu0 %v1231_v4 }
 0x1ee   :  { %v351_v40 = vpop.f32.mrb[2].mxu0 }
 0x1ef   :  { %v355_v41 = vadd.f32 %v351_v40, %v281_v39  ;;  %v1035_v42 = vpop.f32.mrb[3].mxu0 }
 0x1f1   :  { %1178 = vtanh.f32 %v355_v41 }
 0x1fb   :  { %v1179_v43 = vpop.eup %1178 }
 0x1fc   :  { %1045 = vmatmul.mubr.msk.f32.vlgmr.msra.gmra.mrb[2].mxu1 %vm198_vm3, %v1179_v43 }
 0x1fd   :  { %1143 = vmatpush3.bf16.msra.mxu1 %v1308_v7  ;;  %1066 = vmatprep.mubr.msk.f32.mxu1 %vm1232_vm1, %v1233_v10 }
 0x1fe   :  { %1144 = vmatprep.subr.bf16.mxu1 %v1231_v4 }
 0x201   :  { %1146 = vmatpush3.bf16.msra.mxu1 %v1322_v9 }
 0x202   :  { %1153 = vmatprep.subr.bf16.mxu1 %v1231_v4 }
 0x2cf   :  { %v427_v45 = vpop.f32.mrb[2].mxu1 }
 0x2d0   :  { %v431_v46 = vadd.f32 %v427_v45, %v357_v44  ;;  %v1046_v47 = vpop.f32.mrb[3].mxu1 }
 0x2d2   :  { %1180 = vtanh.f32 %v431_v46 }
 0x2dc   :  { %v1181_v48 = vpop.eup %1180 }
 0x2dd   :  { %1056 = vmatmul.mubr.msk.f32.vlgmr.msra.gmra.mrb[4].mxu0 %vm198_vm3, %v1181_v48 }
 0x2de   :  { %1149 = vmatpush3.bf16.msra.mxu0 %v1308_v7  ;;  %1077 = vmatprep.mubr.msk.f32.mxu0 %vm1232_vm1, %v1233_v10 }
 0x2df   :  { %1150 = vmatprep.subr.bf16.mxu0 %v1231_v4 }
 0x2e2   :  { %1152 = vmatpush3.bf16.msra.mxu0 %v1322_v9 }
 0x2e3   :  { %1159 = vmatprep.subr.bf16.mxu0 %v1231_v4 }
 0x3b0   :  { %v503_v50 = vpop.f32.mrb[4].mxu0 }
 0x3b1   :  { %v507_v51 = vadd.f32 %v503_v50, %v433_v49  ;;  %v1057_v52 = vpop.f32.mrb[5].mxu0 }
 0x3b3   :  { %1182 = vtanh.f32 %v507_v51 }
 0x3bd   :  { %v1183_v53 = vpop.eup %1182 }
 0x3be   :  { %1067 = vmatmul.mubr.msk.f32.vlgmr.msra.gmra.mrb[4].mxu1 %vm198_vm3, %v1183_v53 }
 0x3bf   :  { %1155 = vmatpush3.bf16.msra.mxu1 %v1308_v7  ;;  %1088 = vmatprep.mubr.msk.f32.mxu1 %vm1232_vm1, %v1233_v10 }
 0x3c0   :  { %1156 = vmatprep.subr.bf16.mxu1 %v1231_v4 }
 0x3c3   :  { %1158 = vmatpush3.bf16.msra.mxu1 %v1322_v9 }
 0x3c4   :  { %1165 = vmatprep.subr.bf16.mxu1 %v1231_v4 }
 0x491   :  { %v579_v55 = vpop.f32.mrb[4].mxu1 }
 0x492   :  { %v583_v56 = vadd.f32 %v579_v55, %v509_v54  ;;  %v1068_v57 = vpop.f32.mrb[5].mxu1 }
 0x494   :  { %1184 = vtanh.f32 %v583_v56 }
 0x49e   :  { %v1185_v58 = vpop.eup %1184 }
 0x49f   :  { %1078 = vmatmul.mubr.msk.f32.vlgmr.msra.gmra.mrb[6].mxu0 %vm198_vm3, %v1185_v58 }
 0x4a0   :  { %1161 = vmatpush3.bf16.msra.mxu0 %v1308_v7  ;;  %1099 = vmatprep.mubr.msk.f32.mxu0 %vm1232_vm1, %v1233_v10  ;;  %v814_v7 = vld [vmem:[%s1500_s5 + $0x8] sm:$0xff] }
 0x4a1   :  { %1162 = vmatprep.subr.bf16.mxu0 %v1231_v4 }
 0x4a4   :  { %1164 = vmatpush3.bf16.msra.mxu0 %v1322_v9  ;;  %v1166_v9 = vpack.c.bf16 %v814_v7, %v813_v6 }
 0x572   :  { %v655_v60 = vpop.f32.mrb[6].mxu0 }
 0x573   :  { %v659_v61 = vadd.f32 %v655_v60, %v585_v59  ;;  %v1079_v62 = vpop.f32.mrb[7].mxu0 }
 0x575   :  { %1186 = vtanh.f32 %v659_v61 }
 0x57f   :  { %v1187_v63 = vpop.eup %1186 }
 0x580   :  { %1089 = vmatmul.mubr.msk.f32.vlgmr.msra.gmra.mrb[6].mxu1 %vm198_vm3, %v1187_v63 }
 0x581   :  { %1110 = vmatprep.mubr.msk.f32.mxu1 %vm1232_vm1, %v1233_v10  ;;  %v816_v10 = vld [vmem:[%s1500_s5 + $0x18] sm:$0xff]  ;;  %1167 = vmatpush3.bf16.msra.mxu1 %v1166_v9  ;;  %s906_s5 = sshll.u32 %s1234_s21, 4  ;;  %s907_s5 = int_to_ptr.vmem [resolvable:$true] %s906_s5 }
 0x582   :  { %v1169_v11 = vpack.c.bf16 %v816_v10, %v815_v8  ;;  %1168 = vmatprep.subr.bf16.mxu1 %v1231_v4  ;;  %s1204_s25 = scalar_lea.vmem %s907_s5, 32  ;;  %p1209_p6 = scmp.lt.s32.totalorder %s907_s5, %s907_s5 }
 0x583   :  { %p1205_p5 = scmp.ne.s32.totalorder %s907_s5, %s1204_s25  ;;  %p1210_p7 = scmp.lt.s32.totalorder %s1204_s25, %s1204_s25 }
 0x585   :  { %1170 = vmatpush3.bf16.msra.mxu1 %v1169_v11  ;;  %p1211_p8 = por %p1210_p7, %p1209_p6 }
 0x587   :  { %p1212_p9 = pnand %p1211_p8, %p1205_p5 }
 0x653   :  { %v731_v1 = vpop.f32.mrb[6].mxu1 }
 0x654   :  { %v735_v2 = vadd.f32 %v731_v1, %v661_v0  ;;  %v1090_v3 = vpop.f32.mrb[7].mxu1 }
 0x656   :  { %1188 = vtanh.f32 %v735_v2 }
 0x660   :  { %v1189_v5 = vpop.eup %1188 }
 0x661   :  { %1100 = vmatmul.mubr.msk.f32.vlgmr.msra.gmra.mrb[8].mxu0 %vm198_vm3, %v1189_v5 }
 0x734   :  { %v807_v13 = vpop.f32.mrb[8].mxu0 }
 0x735   :  { %v811_v14 = vadd.f32 %v807_v13, %v737_v12  ;;  %v1101_v15 = vpop.f32.mrb[9].mxu0 }
 0x737   :  { %1190 = vtanh.f32 %v811_v14 }
 0x741   :  { %v1191_v16 = vpop.eup %1190 }
 0x742   :  { %1111 = vmatmul.mubr.msk.f32.vlgmr.msra.gmra.mrb[8].mxu1 %vm198_vm3, %v1191_v16 }
 0x815   :  { %v893_v18 = vpop.f32.mrb[8].mxu1 }
 0x816   :  { %v894_v19 = vadd.f32 %v956_v17, %v893_v18  ;;  %v1112_v20 = vpop.f32.mrb[9].mxu1 }
 0x818   :  { %v897_v4 = vmax.f32 %v894_v19, 0.0 }
 0x81a   :  { %899 = vst.msk [vmem:[#allocation7] sm:$0x3] %vm898_vm4, %v897_v4 }
 0x81b   :  { %1215 = shalt.err (!%p1212_p9)
}
 0x81c   :  { %s1216_s6 = scalar_lea.hbm %s1502_s7, 32 }
 0x81d   :  { %p1217_p10 = scmp.ne.s32.totalorder %s1502_s7, %s1216_s6  ;;  %p1220_p11 = scmp.lt.u32.totalorder %s1216_s6, %s1502_s7 }
 0x81f   :  { %p1222_p12 = pnand %p1220_p11, %p1217_p10 }
 0x821   :  { %1225 = shalt.err (!%p1222_p12)
}
 0x822   :  { %909 = dma.vmem_to_hbm [thread:$0]  %s907_s5, 32, %s1502_s7, [#allocation5]  }
 0x823   :  { %1228 = dma.done.wait [#allocation5], 32  }
 0x824   :  { %1229 = vsyncadd [#allocation5], 4294967264 }
 0x825   :  { %913 = vsyncpa [#allocation5], 1 }
 0x826   :  { %914 = vsyncpa [#allocation6], 1 }

</bundles_post_ra>
